<compile_context>
chip_gen: v5e
topology: v5e:2x2
jax: 0.10.0
libtpu: 0.0.40
codegen_flags: <defaults>
</compile_context>

<pallas_src>
import functools

import jax
import jax.numpy as jnp
from jax.experimental import pallas as pl
from jax.experimental.pallas import tpu as pltpu

LANES = 128          # vreg lane width
ACC_ROWS = 8         # vreg sublane count -> accumulator is one f32 vreg (8,128)
MAX_TILE_ROWS = 4096 # 4096*128*4B = 2 MiB per input block
NUM_CORES = 2        # leading "parallel" axis (megacore split on v7x; no-op on 1-TC chips)


def _smooth_l1_partial_kernel(x_ref, y_ref, o_ref, acc_ref, *, valid_rows, needs_mask):
    """Per-core partial sums of smooth-L1 (beta=1.0) elementwise losses."""
    c = pl.program_id(0)              # core / partial index ("parallel")
    k = pl.program_id(1)              # sequential reduction axis ("arbitrary")
    k_last = pl.num_programs(1) - 1

    @pl.when(k == 0)
    def _():
        acc_ref[...] = jnp.zeros_like(acc_ref)

    # Upcast in-kernel (keeps HBM traffic at native width; f32 VPU math on all gens).
    x = x_ref[...].astype(jnp.float32)
    y = y_ref[...].astype(jnp.float32)
    d = x - y
    ad = jnp.abs(d)
    # beta = 1.0 (PyTorch default): 0.5*d^2 if |d| < 1 else |d| - 0.5
    per_elem = jnp.where(ad < 1.0, 0.5 * d * d, ad - 0.5)

    tile_rows, lanes = per_elem.shape
    if needs_mask:
        # Zero out rows belonging to the ragged last block / core-overhang blocks.
        step = c * pl.num_programs(1) + k           # global block index (unclamped)
        row_ids = jax.lax.broadcasted_iota(jnp.int32, (tile_rows, lanes), 0)
        global_row = step * tile_rows + row_ids
        per_elem = jnp.where(global_row < valid_rows, per_elem, 0.0)

    # Fold the (tile_rows, 128) block onto the (8, 128) accumulator: pure VPU adds
    # (tile_rows is always a multiple of 8). The cross-lane reduce happens once,
    # outside the kernel.
    acc_ref[...] += per_elem.reshape(-1, ACC_ROWS, lanes).sum(axis=0)

    @pl.when(k == k_last)
    def _():
        o_ref[...] = acc_ref[...].reshape(o_ref.shape)


def smooth_l1_loss(x, y):
    """Matches torch.nn.SmoothL1Loss()(x, y): mean reduction, beta=1.0."""
    assert x.shape == y.shape, "SmoothL1Loss expects matching shapes"
    n = x.size

    xf = x.reshape(-1)
    yf = y.reshape(-1)

    # Only pad when n is not a multiple of 1024 (one (8,128) vreg of elements).
    # Padded entries are zero in both x and y -> contribute exactly 0 to the sum.
    chunk = ACC_ROWS * LANES
    padded = ((n + chunk - 1) // chunk) * chunk
    if padded != n:
        xf = jnp.pad(xf, (0, padded - n))
        yf = jnp.pad(yf, (0, padded - n))
    rows = padded // LANES
    x2 = xf.reshape(rows, LANES)
    y2 = yf.reshape(rows, LANES)

    # Block rows: full array if small, else 4096 rows (2 MiB f32 per input block).
    tile_rows = rows if rows <= MAX_TILE_ROWS else MAX_TILE_ROWS
    num_blocks = pl.cdiv(rows, tile_rows)
    bpc = pl.cdiv(num_blocks, NUM_CORES)  # blocks per core
    # Mask only needed when the last block is ragged or cores have overhang steps.
    needs_mask = (num_blocks * tile_rows != rows) or (NUM_CORES * bpc != num_blocks)

    def in_map(c, k):
        # Clamp so overhang steps re-read an in-range block (their contribution is
        # masked to zero in-kernel via the unclamped global row index).
        return (jnp.minimum(c * bpc + k, num_blocks - 1), 0)

    kernel = functools.partial(
        _smooth_l1_partial_kernel, valid_rows=rows, needs_mask=needs_mask
    )

    partials = pl.pallas_call(
        kernel,
        out_shape=jax.ShapeDtypeStruct((NUM_CORES, ACC_ROWS, LANES), jnp.float32),
        grid_spec=pltpu.PrefetchScalarGridSpec(
            num_scalar_prefetch=0,
            grid=(NUM_CORES, bpc),
            in_specs=[
                pl.BlockSpec((tile_rows, LANES), in_map),
                pl.BlockSpec((tile_rows, LANES), in_map),
            ],
            out_specs=pl.BlockSpec((1, ACC_ROWS, LANES), lambda c, k: (c, 0, 0)),
            scratch_shapes=[pltpu.VMEM((ACC_ROWS, LANES), jnp.float32)],
        ),
        compiler_params=pltpu.CompilerParams(
            # axis 0: independent per-core partials (megacore on v7x)
            # axis 1: sequential reduction with resident accumulator
            dimension_semantics=("parallel", "arbitrary"),
        ),
    )(x2, y2)

    # Tiny final reduce (2*8*128 values) + mean in plain JAX.
    total = jnp.sum(partials, dtype=jnp.float32)
    return (total / jnp.float32(n)).astype(jnp.float32)


if __name__ == "__main__":
    key = jax.random.PRNGKey(0)
    kx, ky = jax.random.split(key)
    x = jax.random.normal(kx, (2, 4, 16, 16), dtype=jnp.float32)  # NCHW
    y = jax.random.normal(ky, (2, 4, 16, 16), dtype=jnp.float32)

    loss = smooth_l1_loss(x, y)
    jax.block_until_ready(loss)

    # Reference check (plain JAX, same formula as torch SmoothL1Loss default)
    d = x - y
    ad = jnp.abs(d)
    ref = jnp.mean(jnp.where(ad < 1.0, 0.5 * d * d, ad - 0.5))
    assert jnp.allclose(loss, ref, rtol=1e-5, atol=1e-6), (loss, ref)

    print("KERNEL_OK")
</pallas_src>

<mosaic_0001>
module attributes {stable_mosaic.version = 11 : i64} {
  func.func @_smooth_l1_partial_kernel(%arg0: i32, %arg1: i32, %arg2: memref<16x128xf32, #tpu.memory_space<vmem>>, %arg3: memref<16x128xf32, #tpu.memory_space<vmem>>, %arg4: memref<1x8x128xf32, #tpu.memory_space<vmem>>, %arg5: memref<8x128xf32, #tpu.memory_space<vmem>>) attributes {dimension_semantics = [#tpu.dimension_semantics<parallel>, #tpu.dimension_semantics<arbitrary>], iteration_bounds = array<i64: 2, 1>, scalar_prefetch = 0 : i64, scratch_operands = 1 : i64, tpu.core_type = #tpu.core_type<tc>, window_params = [{transform_indices = @transform_0, window_bounds = array<i64: 16, 128>}, {transform_indices = @transform_1, window_bounds = array<i64: 16, 128>}, {transform_indices = @transform_2, window_bounds = array<i64: 1, 8, 128>}]} {
    %c0_i32 = arith.constant 0 : i32
    %0 = arith.cmpi eq, %arg1, %c0_i32 : i32
    %1 = arith.extui %0 : i1 to i32
    %c0_i32_0 = arith.constant 0 : i32
    %2 = arith.cmpi ne, %1, %c0_i32_0 : i32
    scf.if %2 {
      %cst_15 = arith.constant 0.000000e+00 : f32
      %33 = vector.broadcast %cst_15 : f32 to vector<8x128xf32>
      %c0_16 = arith.constant 0 : index
      %c0_17 = arith.constant 0 : index
      %34 = vector.load %arg5[%c0_16, %c0_17] : memref<8x128xf32, #tpu.memory_space<vmem>>, vector<8x128xf32>
      tpu.vector_store %arg5[%c0_16, %c0_17], %33 {strides = array<i32>} : memref<8x128xf32, #tpu.memory_space<vmem>>, vector<8x128xf32>,
    } else {
    }
    %c0 = arith.constant 0 : index
    %c0_1 = arith.constant 0 : index
    %3 = vector.load %arg2[%c0, %c0_1] : memref<16x128xf32, #tpu.memory_space<vmem>>, vector<16x128xf32>
    %c0_2 = arith.constant 0 : index
    %c0_3 = arith.constant 0 : index
    %4 = vector.load %arg3[%c0_2, %c0_3] : memref<16x128xf32, #tpu.memory_space<vmem>>, vector<16x128xf32>
    %5 = arith.subf %3, %4 : vector<16x128xf32>
    %6 = math.absf %5 : vector<16x128xf32>
    %cst = arith.constant 1.000000e+00 : f32
    %7 = vector.broadcast %cst : f32 to vector<16x128xf32>
    %8 = arith.cmpf olt, %6, %7 : vector<16x128xf32>
    %cst_4 = arith.constant 5.000000e-01 : f32
    %9 = vector.broadcast %cst_4 : f32 to vector<16x128xf32>
    %10 = arith.mulf %9, %5 : vector<16x128xf32>
    %11 = arith.mulf %10, %5 : vector<16x128xf32>
    %cst_5 = arith.constant 5.000000e-01 : f32
    %12 = vector.broadcast %cst_5 : f32 to vector<16x128xf32>
    %13 = arith.subf %6, %12 : vector<16x128xf32>
    %14 = arith.select %8, %11, %13 : vector<16x128xi1>, vector<16x128xf32>
    %c1_i32 = arith.constant 1 : i32
    %15 = arith.muli %arg0, %c1_i32 : i32
    %16 = arith.addi %15, %arg1 : i32
    %17 = tpu.iota {dimensions = array<i32: 0>} : vector<16x128xi32>
    %c16_i32 = arith.constant 16 : i32
    %18 = arith.muli %16, %c16_i32 : i32
    %19 = vector.broadcast %18 : i32 to vector<16x128xi32>
    %20 = arith.addi %19, %17 : vector<16x128xi32>
    %c16_i32_6 = arith.constant 16 : i32
    %21 = vector.broadcast %c16_i32_6 : i32 to vector<16x128xi32>
    %22 = arith.cmpi slt, %20, %21 : vector<16x128xi32>
    %cst_7 = arith.constant 0.000000e+00 : f32
    %23 = vector.broadcast %cst_7 : f32 to vector<16x128xf32>
    %24 = arith.select %22, %14, %23 : vector<16x128xi1>, vector<16x128xf32>
    %c0_8 = arith.constant 0 : index
    %c0_9 = arith.constant 0 : index
    %25 = vector.load %arg5[%c0_8, %c0_9] : memref<8x128xf32, #tpu.memory_space<vmem>>, vector<8x128xf32>
    %26 = vector.shape_cast %24 : vector<16x128xf32> to vector<2x8x128xf32>
    %cst_10 = arith.constant dense<0.000000e+00> : vector<8x128xf32>
    %27 = vector.multi_reduction <add>, %26, %cst_10 [0] : vector<2x8x128xf32> to vector<8x128xf32>
    %28 = arith.addf %25, %27 : vector<8x128xf32>
    %c0_11 = arith.constant 0 : index
    %c0_12 = arith.constant 0 : index
    %29 = vector.load %arg5[%c0_11, %c0_12] : memref<8x128xf32, #tpu.memory_space<vmem>>, vector<8x128xf32>
    tpu.vector_store %arg5[%c0_11, %c0_12], %28 {strides = array<i32>} : memref<8x128xf32, #tpu.memory_space<vmem>>, vector<8x128xf32>,
    %c0_i32_13 = arith.constant 0 : i32
    %30 = arith.cmpi eq, %arg1, %c0_i32_13 : i32
    %31 = arith.extui %30 : i1 to i32
    %c0_i32_14 = arith.constant 0 : i32
    %32 = arith.cmpi ne, %31, %c0_i32_14 : i32
    scf.if %32 {
      %c0_15 = arith.constant 0 : index
      %c0_16 = arith.constant 0 : index
      %33 = vector.load %arg5[%c0_15, %c0_16] : memref<8x128xf32, #tpu.memory_space<vmem>>, vector<8x128xf32>
      %34 = vector.shape_cast %33 : vector<8x128xf32> to vector<1x8x128xf32>
      %c0_17 = arith.constant 0 : index
      %c0_18 = arith.constant 0 : index
      %c0_19 = arith.constant 0 : index
      %35 = vector.load %arg4[%c0_17, %c0_18, %c0_19] : memref<1x8x128xf32, #tpu.memory_space<vmem>>, vector<1x8x128xf32>
      tpu.vector_store %arg4[%c0_17, %c0_18, %c0_19], %34 {strides = array<i32>} : memref<1x8x128xf32, #tpu.memory_space<vmem>>, vector<1x8x128xf32>,
    } else {
    }
    return
  }
  func.func @transform_0(%arg0: i32, %arg1: i32) -> (i32, i32) {
    %c1_i32 = arith.constant 1 : i32
    %0 = arith.muli %arg0, %c1_i32 : i32
    %1 = arith.addi %0, %arg1 : i32
    %c0_i32 = arith.constant 0 : i32
    %2 = arith.minsi %1, %c0_i32 : i32
    %c0_i32_0 = arith.constant 0 : i32
    %c0_i32_1 = arith.constant 0 : i32
    return %2, %c0_i32_0 : i32, i32
  }
  func.func @transform_1(%arg0: i32, %arg1: i32) -> (i32, i32) {
    %c1_i32 = arith.constant 1 : i32
    %0 = arith.muli %arg0, %c1_i32 : i32
    %1 = arith.addi %0, %arg1 : i32
    %c0_i32 = arith.constant 0 : i32
    %2 = arith.minsi %1, %c0_i32 : i32
    %c0_i32_0 = arith.constant 0 : i32
    %c0_i32_1 = arith.constant 0 : i32
    return %2, %c0_i32_0 : i32, i32
  }
  func.func @transform_2(%arg0: i32, %arg1: i32) -> (i32, i32, i32) {
    %c0_i32 = arith.constant 0 : i32
    %c0_i32_0 = arith.constant 0 : i32
    %c0_i32_1 = arith.constant 0 : i32
    return %arg0, %c0_i32, %c0_i32_0 : i32, i32, i32
  }
}

</mosaic_0001>

<bundles_post_ra>
// kernel: tpu_custom_call.1
= control target key start
LH: loop header
LB: loop body
LE: loop exit
PB: predicated region body
PF: predicated region fallthrough
CT: control target
= control target key end

     0   :  { %7 = vsyncpa [#allocation4], 0  ;;  %s885_s0 = inlined_call_operand.hbm [shape: f32[16,128], index: 0, kind: input, shape index: {}]   ;;  %s886_s1 = inlined_call_operand.hbm [shape: f32[16,128], index: 1, kind: input, shape index: {}]   ;;  %s887_s2 = inlined_call_operand.hbm [shape: f32[2,8,128], index: 2, kind: output, shape index: {}]  }
   0x1   :  { %9 = vsyncpa [#allocation4 + $0x1], 0 }
   0x2   :  { %10 = vsyncpa [#allocation7], 0 }
   0x3   :  { %12 = vsyncpa [#allocation7 + $0x1], 0 }
   0x4   :  { %13 = vsyncpa [#allocation5], 0 }
   0x5   :  { %15 = vsyncpa [#allocation5 + $0x1], 0  ;;  %s709_s9 = smov 0   ;;  %s711_s10 = smov 0  }
   0x6   :  { %s713_s11 = smov 0   ;;  %s715_s12 = smov 0  }
   0x7   :  { %s717_s13 = smov 0   ;;  %s719_s14 = smov 0  }
   0x8   :  { %s721_s15 = smov 0   ;;  %s723_s16 = smov 0  }
   0x9 LB: > { %s405_s17 = sadd.s32 4294967295, %s688_s16   ;;  %s406_s18 = sadd.s32 4294967294, %s688_s16   ;;  %s688_s16 = sphi %s723_s16, %s21_s16   ;;  %s684_s15 = sphi %s721_s15, %s899_s15   ;;  %s680_s14 = sphi %s719_s14, %s898_s14   ;;  %s676_s13 = sphi %s717_s13, %s875_s13   ;;  %s672_s12 = sphi %s715_s12, %s897_s12   ;;  %s668_s11 = sphi %s713_s11, %s896_s11   ;;  %s664_s10 = sphi %s711_s10, %s895_s10   ;;  %s660_s9 = sphi %s709_s9, %s894_s9  }
   0xa   : > { %s33_s19 = sadd.s32 1, %s684_s15  ;;  %p657_p1 = scmp.ne.s32.totalorder %s676_s13, 0 }
   0xb   : > { %p35_p0 = scmp.ge.s32.totalorder %s33_s19, 2  ;;  %p54_p2 = scmp.eq.s32.totalorder %s688_s16, 0 }
   0xc   : > { %p59_p3 = scmp.ne.s32.totalorder %s676_s13, %s672_s12  ;;  %p60_p5 = scmp.eq.s32.totalorder %s405_s17, 0 }
   0xd   : > { %s901_s19 = smov (%p35_p0, %s33_s19), 0  ;;  %p755_p4 = por %p657_p1, %p54_p2 }
   0xe   : > { %p759_p6 = por %p60_p5, %p59_p3  ;;  %s101_s22 = ssub.s32 %s684_s15, %s901_s19 }
   0xf   : > { %p102_p7 = scmp.eq.s32.totalorder %s101_s22, 0  ;;  %s104_s23 = sadd.s32 1, %s668_s11 }
  0x10   : > { %p114_p8 = scmp.ne.s32.totalorder %s668_s11, %s664_s10  ;;  %p115_p9 = scmp.eq.s32.totalorder %s405_s17, 1 }
  0x11   : > { %s767_s24 = scalar_select %p102_p7, %s668_s11, %s104_s23  }
  0x12   : > { %p120_p10 = scmp.ne.s32.totalorder %s664_s10, %s660_s9  ;;  %p121_p11 = scmp.eq.s32.totalorder %s406_s18, 1 }
  0x13   : > { %p773_p12 = por %p115_p9, %p114_p8  ;;  %p408_p13 = scmp.ge.s32.totalorder %s688_s16, 2 }
  0x14   : > { %p778_p0 = por %p121_p11, %p120_p10  ;;  %p445_p1 = scmp.lt.s32.totalorder %s688_s16, 2 }
  0x15   : > { %s154_s29 = sshll.u32 %s885_s0, 4  ;;  %s690_s30 = smov [#allocation3]   ;;  %s155_s29 = int_to_ptr.hbm [resolvable:$true] %s154_s29 }
  0x16   : > { %s156_s3 = sshll.u32 %s690_s30, 4  ;;  %p788_p2 = pnand %p445_p1, %p755_p4  ;;  %s157_s3 = int_to_ptr.vmem [resolvable:$true] %s156_s3 }
  0x17   : > { %p415_p3 = scmp.ge.s32.totalorder %s688_s16, 1  ;;  %p189_p5 = scmp.lt.s32.totalorder %s688_s16, 3 }
  0x18   : > { %s521_s5 = sshra.s32 %s155_s29, 4  ;;  %p525_p8 = pneg %p788_p2  ;;  %s522_s5 = int_to_ptr.hbm [resolvable:$true] %s521_s5 }
  0x19   : > { %s523_s6 = scalar_lea.hbm %s522_s5, 16  ;;  %s528_s12 = scalar_lea.hbm %s885_s0, 16 }
  0x1a   : > { %p524_p7 = scmp.ne.s32.totalorder %s522_s5, %s523_s6  ;;  %p530_p4 = scmp.lt.s32.totalorder %s528_s12, %s523_s6 }
  0x1c   : > { %p526_p9 = pnand %p525_p8, %p524_p7 }
  0x1e   : > { %p527_p10 = pneg %p526_p9 }
  0x20   : > { %p532_p11 = pnand %p530_p4, %p527_p10 }
  0x22   : > { %535 = shalt.err (!%p532_p11)
}
  0x23   : > { %s691_s17 = smov 128   ;;  %s692_s18 = smov 8  }
  0x24   : > { %437 = dma.hbm_to_vmem [thread:$0]  (!%p788_p2), %s155_s29, 256, %s157_s3, [#allocation4], %s691_s17, %s691_s17, %s692_s18  }
  0x25   : > { %p808_p1 = pnand %p415_p3, %p189_p5  ;;  %s179_s27 = sshll.u32 %s886_s1, 4  ;;  %s180_s27 = int_to_ptr.hbm [resolvable:$true] %s179_s27 }
  0x26   : > { %s693_s28 = smov [#allocation6]   ;;  %s551_s5 = sshra.s32 %s180_s27, 4  ;;  %s552_s5 = int_to_ptr.hbm [resolvable:$true] %s551_s5 }
  0x27   : > { %s181_s30 = sshll.u32 %s693_s28, 4  ;;  %s553_s6 = scalar_lea.hbm %s552_s5, 16  ;;  %s182_s30 = int_to_ptr.vmem [resolvable:$true] %s181_s30 }
  0x28   : > { %p554_p7 = scmp.ne.s32.totalorder %s552_s5, %s553_s6  ;;  %s558_s7 = scalar_lea.hbm %s886_s1, 16 }
  0x29   : > { %p560_p3 = scmp.lt.s32.totalorder %s558_s7, %s553_s6 }
  0x2a   : > { %p556_p9 = pnand %p554_p7, %p525_p8 }
  0x2c   : > { %p557_p10 = pneg %p556_p9 }
  0x2e   : > { %p562_p5 = pnand %p560_p3, %p557_p10 }
  0x30   : > { %565 = shalt.err (!%p562_p5)
}
  0x31   : > { %440 = dma.hbm_to_vmem [thread:$0]  (!%p788_p2), %s180_s27, 256, %s182_s30, [#allocation7], %s691_s17, %s691_s17, %s692_s18  }
  0x32   : > { %193 = sbr.rel (%p808_p1) target bundleno = 74 (0x4a), region = 28  ;;  %s195_s8 = sand.u32 (!%p808_p1), 1, %s676_s13  }
  0x33   : > { %s416_s12 = sshll.u32 (!%p808_p1), %s195_s8, 4  ;;  %s196_s22 = scalar_lea.sflag (!%p808_p1), [#allocation4], %s195_s8 }
  0x34   : > { %s199_s23 = scalar_lea.vmem (!%p808_p1), [#allocation3], %s416_s12 }
  0x37   : > { %646 = dma.done.wait (%p759_p6), %s196_s22, 256  }
  0x38   : > { %648 = vsyncadd (%p759_p6), %s196_s22, 4294967040  ;;  %s206_s28 = scalar_lea.sflag [#allocation7], %s195_s8  ;;  %s209_s5 = scalar_lea.vmem [#allocation6], %s416_s12 }
  0x39   : > { %650 = dma.done.wait (%p759_p6), %s206_s28, 256  }
  0x3a   : > { %652 = vsyncadd (%p759_p6), %s206_s28, 4294967040  ;;  %v268_v0 = vlaneseq  ;;  %s421_s4 = sshll.u32 %s680_s14, 4  ;;  %s233_s17 = sand.u32 1, %s664_s10   ;;  %v249_v4 = vld [vmem:[%s199_s23] sm:$0xff]  ;;  %v250_v5 = vld [vmem:[%s199_s23 + $0x8] sm:$0xff] }
  0x3b   : > { %v272_v3 = vstv %s421_s4  ;;  %v251_v6 = vld [vmem:[%s209_s5] sm:$0xff]  ;;  %s838_s18 = sshll.u32 %s233_s17, 3  ;;  %v252_v7 = vld [vmem:[%s209_s5 + $0x8] sm:$0xff]  ;;  %s423_s21 = sshll.u32 %s680_s14, 3 }
  0x3c   : > { %v269_v1 = vshrl.u32 %v268_v0, 7  ;;  %v253_v8 = vsub.f32 %v249_v4, %v251_v6  ;;  %v254_v10 = vsub.f32 %v250_v5, %v252_v7  ;;  %s299_s30 = scalar_lea.hbm %s887_s2, %s423_s21  ;;  %s235_s14 = scalar_lea.vmem [#allocation8], %s838_s18 }
  0x3d   : > { %s301_s6 = sshll.u32 %s235_s14, 4  ;;  %s303_s29 = sshll.u32 %s299_s30, 4  ;;  %s302_s6 = int_to_ptr.vmem [resolvable:$true] %s301_s6  ;;  %s304_s29 = int_to_ptr.hbm [resolvable:$true] %s303_s29 }
  0x3e   : > { %v270_v2 = vadd.s32 8, %v269_v1  ;;  %v273_v9 = vadd.s32 %v272_v3, %v269_v1  ;;  %v255_v12 = vand.u32 2147483647, %v253_v8  ;;  %v259_v13 = vmul.f32 0.5, %v253_v8  ;;  %s289_s3 = scalar_lea.sflag [#allocation5], %s233_s17  ;;  %s595_s7 = sshra.s32 %s304_s29, 4  ;;  %s596_s7 = int_to_ptr.hbm [resolvable:$true] %s595_s7 }
  0x3f   : > { %v256_v14 = vand.u32 2147483647, %v254_v10  ;;  %v260_v15 = vmul.f32 0.5, %v254_v10  ;;  %s597_s8 = scalar_lea.hbm %s596_s7, 8  ;;  %s601_s23 = scalar_lea.hbm %s887_s2, 16 }
  0x40   : > { %v274_v11 = vadd.s32 %v272_v3, %v270_v2  ;;  %vm257_vm0 = vcmp.lt.f32.partialorder %v255_v12, 1.0  ;;  %v261_v16 = vmul.f32 %v259_v13, %v253_v8  ;;  %v419_v17 = vadd.f32 -0.5, %v255_v12  ;;  %p598_p6 = scmp.ne.s32.totalorder %s596_s7, %s597_s8  ;;  %p602_p4 = scmp.lt.s32.totalorder %s596_s7, %s887_s2 }
  0x41   : > { %vm275_vm1 = vcmp.lt.s32.totalorder %v273_v9, 16  ;;  %vm258_vm2 = vcmp.lt.f32.partialorder %v256_v14, 1.0  ;;  %v262_v18 = vmul.f32 %v260_v15, %v254_v10  ;;  %v420_v19 = vadd.f32 -0.5, %v256_v14  ;;  %p603_p11 = scmp.lt.s32.totalorder %s601_s23, %s597_s8 }
  0x42   : > { %vm276_vm3 = vcmp.lt.s32.totalorder %v274_v11, 16  ;;  %v265_v20 = vsel %vm257_vm0, %v261_v16, %v419_v17  ;;  %p599_p2 = pnand %p598_p6, %p773_p12 }
  0x43   : > { %v266_v21 = vsel %vm258_vm2, %v262_v18, %v420_v19  ;;  %v277_v22 = vsel %vm275_vm1, %v265_v20, 0.0  ;;  %p604_p1 = por %p603_p11, %p602_p4 }
  0x44   : > { %v278_v23 = vsel %vm276_vm3, %v266_v21, 0.0  ;;  %p600_p8 = pneg %p599_p2 }
  0x45   : > { %v280_v24 = vadd.f32 %v278_v23, %v277_v22 }
  0x46   : > { %p605_p7 = pnand %p604_p1, %p600_p8 }
  0x47   : > { %287 = vst [vmem:[%s235_s14] sm:$0xff] %v280_v24 }
  0x48   : > { %608 = shalt.err (!%p605_p7)
}
  0x49   : > { %432 = dma.vmem_to_hbm [thread:$0]  (%p773_p12), %s302_s6, 128, %s304_s29, %s289_s3  }
  0x4a PF: > { %s315_s4 = sand.u32 1, %s660_s9   ;;  %p442_p9 = pnand %p408_p13, %p778_p0 }
  0x4b   : > { %s316_s17 = scalar_lea.sflag [#allocation5], %s315_s4 }
  0x4c   : > { %p443_p10 = pneg %p442_p9 }
  0x4e   : > { %654 = dma.done.wait (%p443_p10), %s316_s17, 128  }
  0x4f   : > { %656 = vsyncadd (%p443_p10), %s316_s17, 4294967168  ;;  %s21_s16 = sadd.s32 1, %s688_s16   ;;  %s894_s9 = smov %s664_s10 }
  0x50   : > { %p18_p3 = scmp.ge.s32.totalorder %s21_s16, 4   ;;  %s895_s10 = smov %s668_s11 }
  0x51   : > { %s896_s11 = smov %s767_s24  ;;  %s897_s12 = smov %s676_s13 }
  0x52   : > { %s875_s13 = smov 0   ;;  %s898_s14 = smov %s684_s15 }
  0x53   : > { %s899_s15 = smov %s901_s19  ;;  %20 = sbr.rel (!%p18_p3) target bundleno = 9 (0x9), region = 94 }
  0x58   :  { %322 = vsyncpa [#allocation4], 1 }
  0x59   :  { %324 = vsyncpa [#allocation4 + $0x1], 1 }
  0x5a   :  { %325 = vsyncpa [#allocation7], 1 }
  0x5b   :  { %327 = vsyncpa [#allocation7 + $0x1], 1 }
  0x5c   :  { %328 = vsyncpa [#allocation5], 1 }
  0x5d   :  { %330 = vsyncpa [#allocation5 + $0x1], 1 }

</bundles_post_ra>
